<compile_context>
chip_gen: v7x
topology: tpu7x:2x2x1
jax: 0.10.0
libtpu: 0.0.40
codegen_flags: <defaults>
</compile_context>

<pallas_src>
import math
import functools

import jax
import jax.numpy as jnp
from jax import lax
from jax.experimental import pallas as pl
from jax.experimental.pallas import tpu as pltpu

# Safe on every listed generation (v5e/v6e have 128 MiB physical VMEM, v7x 64 MiB)
_VMEM_LIMIT = 48 * 1024 * 1024
_NEG_INF = -1e30


# ---------------------------------------------------------------------------
# Pallas kernels
# ---------------------------------------------------------------------------
def _linear_kernel(x_ref, w_ref, b_ref, o_ref, acc_ref):
    # Grid = (M//bm, N//bn, K//bk); the K axis is the reduction ("arbitrary").
    k = pl.program_id(2)

    @pl.when(k == 0)
    def _():
        acc_ref[...] = jnp.zeros_like(acc_ref)

    acc_ref[...] += jnp.dot(x_ref[...], w_ref[...],
                            preferred_element_type=jnp.float32)

    @pl.when(k == pl.num_programs(2) - 1)
    def _():
        o_ref[...] = (acc_ref[...] + b_ref[...].astype(jnp.float32)
                      ).astype(o_ref.dtype)


def pallas_linear(x, w, b, *, out_dtype=None, bm=256, bn=256, bk=512):
    """y = x @ w + b with a tiled K-reduction Pallas matmul.

    Operands are fed to the MXU in bf16 (halves weight HBM traffic, MXU-native),
    accumulation is f32 in a VMEM scratch.  Default tiles (256, 256, 512) are
    sized for v7x's 64 MiB VMEM; v5e/v6e (128 MiB) can go larger.
    """
    M, K = x.shape
    K2, N = w.shape
    assert K == K2
    out_dtype = out_dtype or x.dtype

    bm, bn, bk = min(bm, M), min(bn, N), min(bk, K)
    assert M % bm == 0 and N % bn == 0 and K % bk == 0, (M, N, K, bm, bn, bk)

    x_bf = x.astype(jnp.bfloat16)
    w_bf = w.astype(jnp.bfloat16)
    b2d = b.reshape(1, N).astype(jnp.float32)

    grid = (M // bm, N // bn, K // bk)
    return pl.pallas_call(
        _linear_kernel,
        grid=grid,
        in_specs=[
            pl.BlockSpec((bm, bk), lambda i, j, k: (i, k)),
            pl.BlockSpec((bk, bn), lambda i, j, k: (k, j)),
            pl.BlockSpec((1, bn), lambda i, j, k: (0, j)),
        ],
        out_specs=pl.BlockSpec((bm, bn), lambda i, j, k: (i, j)),
        out_shape=jax.ShapeDtypeStruct((M, N), out_dtype),
        scratch_shapes=[pltpu.VMEM((bm, bn), jnp.float32)],
        compiler_params=pltpu.CompilerParams(
            dimension_semantics=("parallel", "parallel", "arbitrary"),
            vmem_limit_bytes=_VMEM_LIMIT),
    )(x_bf, w_bf, b2d)


def _attn_kernel(*refs, head_dim, scale, causal, has_mask, tq, tk):
    if has_mask:
        (q_ref, k_ref, v_ref, cq_ref, sq_ref, ck_ref, sk_ref, mask_ref,
         o_ref, krot_ref, qrot_sc, m_sc, l_sc, acc_sc) = refs
    else:
        (q_ref, k_ref, v_ref, cq_ref, sq_ref, ck_ref, sk_ref,
         o_ref, krot_ref, qrot_sc, m_sc, l_sc, acc_sc) = refs
        mask_ref = None

    qi = pl.program_id(2)
    ki = pl.program_id(3)
    half = head_dim // 2

    def rope(x, cos, sin_signed):
        # rotate-half RoPE in f32; the sign of the first half is folded into
        # sin_signed = concat([-sin, sin], -1) by the wrapper (no iota/where).
        # TODO(synk): on hardware pltpu.roll(x, shift=half, axis=2) keeps the
        # rotation on the XLU; slice+concat is used here for portability.
        rot = jnp.concatenate([x[..., half:], x[..., :half]], axis=-1)
        return x * cos[None] + rot * sin_signed[None]

    # ---- (re)initialize online-softmax state; cache rotated Q across KV steps
    @pl.when(ki == 0)
    def _():
        m_sc[...] = jnp.full_like(m_sc, -jnp.inf)
        l_sc[...] = jnp.zeros_like(l_sc)
        acc_sc[...] = jnp.zeros_like(acc_sc)
        qrot_sc[...] = rope(q_ref[...].astype(jnp.float32),
                            cq_ref[...], sq_ref[...])

    # ---- RoPE on this K tile (also an output, consumed by the KV cache) -----
    k_rot = rope(k_ref[...].astype(jnp.float32), ck_ref[...], sk_ref[...])
    krot_ref[...] = k_rot.astype(krot_ref.dtype)

    # ---- scores: bf16 MXU matmul, f32 accumulation ---------------------------
    s = jnp.einsum("hqd,hkd->hqk",
                   qrot_sc[...].astype(jnp.bfloat16),
                   k_rot.astype(jnp.bfloat16),
                   preferred_element_type=jnp.float32) * scale

    if causal:
        row = qi * tq + lax.broadcasted_iota(jnp.int32, (tq, tk), 0)
        col = ki * tk + lax.broadcasted_iota(jnp.int32, (tq, tk), 1)
        s = jnp.where((row >= col)[None], s, _NEG_INF)
    if has_mask:
        s = s + mask_ref[...].astype(jnp.float32)   # (1, tq, tk) -> broadcast

    # ---- online softmax ------------------------------------------------------
    m_prev = m_sc[...]
    m_new = jnp.maximum(m_prev, jnp.max(s, axis=-1, keepdims=True))
    alpha = jnp.exp(m_prev - m_new)
    p = jnp.exp(s - m_new)
    l_sc[...] = alpha * l_sc[...] + jnp.sum(p, axis=-1, keepdims=True)
    acc_sc[...] = alpha * acc_sc[...] + jnp.einsum(
        "hqk,hkd->hqd",
        p.astype(jnp.bfloat16), v_ref[...].astype(jnp.bfloat16),
        preferred_element_type=jnp.float32)
    m_sc[...] = m_new

    @pl.when(ki == pl.num_programs(3) - 1)
    def _():
        inv_l = pl.reciprocal(l_sc[...], approx=True)
        o_ref[...] = (acc_sc[...] * inv_l).astype(o_ref.dtype)


def pallas_attention(q, k, v, cos, sin_signed, mask=None, *, causal=False,
                     block_q=None, block_k=None, block_h=None):
    """Fused RoPE + flash attention.

    q/k/v: (B, H, S, D), cos/sin_signed: (S, D), mask: optional (B, 1, S, S).
    Returns (attention output, rotated K), both (B, H, S, D).
    """
    B, H, S, D = q.shape
    scale = 1.0 / math.sqrt(D)

    block_h = H if block_h is None else min(block_h, H)
    block_q = min(block_q or 512, S)
    block_k = min(block_k or 512, S)
    assert H % block_h == 0 and S % block_q == 0 and S % block_k == 0
    assert D % 2 == 0

    grid = (B, H // block_h, S // block_q, S // block_k)

    qmap = lambda b, h, qi, ki: (b, h, qi, 0)
    kmap = lambda b, h, qi, ki: (b, h, ki, 0)

    in_specs = [
        pl.BlockSpec((None, block_h, block_q, D), qmap),
        pl.BlockSpec((None, block_h, block_k, D), kmap),
        pl.BlockSpec((None, block_h, block_k, D), kmap),
        pl.BlockSpec((block_q, D), lambda b, h, qi, ki: (qi, 0)),
        pl.BlockSpec((block_q, D), lambda b, h, qi, ki: (qi, 0)),
        pl.BlockSpec((block_k, D), lambda b, h, qi, ki: (ki, 0)),
        pl.BlockSpec((block_k, D), lambda b, h, qi, ki: (ki, 0)),
    ]
    args = [q, k, v, cos, sin_signed, cos, sin_signed]
    has_mask = mask is not None
    if has_mask:
        in_specs.append(pl.BlockSpec((None, 1, block_q, block_k),
                                     lambda b, h, qi, ki: (b, 0, qi, ki)))
        args.append(mask)

    kernel = functools.partial(
        _attn_kernel, head_dim=D, scale=scale, causal=causal,
        has_mask=has_mask, tq=block_q, tk=block_k)

    return pl.pallas_call(
        kernel,
        grid=grid,
        in_specs=in_specs,
        out_specs=(pl.BlockSpec((None, block_h, block_q, D), qmap),
                   pl.BlockSpec((None, block_h, block_k, D), kmap)),
        out_shape=(jax.ShapeDtypeStruct((B, H, S, D), q.dtype),
                   jax.ShapeDtypeStruct((B, H, S, D), q.dtype)),
        scratch_shapes=[
            pltpu.VMEM((block_h, block_q, D), jnp.float32),   # rotated Q
            pltpu.VMEM((block_h, block_q, 1), jnp.float32),   # m (running max)
            pltpu.VMEM((block_h, block_q, 1), jnp.float32),   # l (running sum)
            pltpu.VMEM((block_h, block_q, D), jnp.float32),   # acc
        ],
        compiler_params=pltpu.CompilerParams(
            dimension_semantics=("parallel", "parallel", "parallel", "arbitrary"),
            vmem_limit_bytes=_VMEM_LIMIT),
    )(*args)


# ---------------------------------------------------------------------------
# Module wrapper (stateless JAX parameters + functional KV-cache emulation)
# ---------------------------------------------------------------------------
def precompute_freqs_cos_sin(dim, end, theta=10000.0):
    freqs = 1.0 / theta ** (jnp.arange(0, dim, 2)[: dim // 2].astype(jnp.float32) / dim)
    t = jnp.arange(end, dtype=jnp.float32)
    angles = jnp.outer(t, freqs)                       # (end, dim // 2)
    return jnp.cos(angles), jnp.sin(angles)


class QuantLlamaAttentionFusedPallas:
    """JAX/Pallas port of tinychat QuantLlamaAttentionFused (seqlen > 1 path)."""

    def __init__(self, hidden_size, num_heads, qkv_w, qkv_b, o_w, o_b,
                 max_position_embeddings):
        self.hidden_size = hidden_size
        self.n_local_heads = num_heads
        self.head_dim = hidden_size // num_heads
        assert self.head_dim % 8 == 0     # cache_k packs the last dim in groups of 8
        # TODO(synk): AWQ int4 qkv/o weights would be dequantized to bf16 inside
        # the linear kernel (v7x MXU has no int modes); dense weights used here.
        self.qkv_w = qkv_w    # (hidden, 3*hidden)
        self.qkv_b = qkv_b    # (3*hidden,)
        self.o_w = o_w        # (hidden, hidden)
        self.o_b = o_b        # (hidden,)
        self.start_pos = 0
        self.cache_v = jnp.zeros(
            (1, num_heads, max_position_embeddings, self.head_dim), jnp.float16)
        self.cache_k = jnp.zeros(
            (1, num_heads, self.head_dim // 8, max_position_embeddings, 8),
            jnp.float16)
        self.cos_tab, self.sin_tab = precompute_freqs_cos_sin(
            self.head_dim, max_position_embeddings * 2)

    def __call__(self, hidden_states, attention_mask=None, use_cache=False,
                 is_causal=False):
        B, S, _ = hidden_states.shape
        H, D = self.n_local_heads, self.head_dim
        if S == 1:
            # TODO(synk): seqlen==1 decode path uses awq_inference_engine's CUDA
            # single_query_attention kernel; not translated here.
            raise NotImplementedError("decode (seqlen==1) path not implemented")

        # --- qkv projection (tiled Pallas matmul, bf16 MXU / f32 acc) --------
        x2d = hidden_states.reshape(B * S, self.hidden_size)
        xqkv = pallas_linear(x2d, self.qkv_w, self.qkv_b,
                             out_dtype=hidden_states.dtype)
        xqkv = xqkv.reshape(B, S, 3, H, D)
        xq, xk, xv = xqkv[:, :, 0], xqkv[:, :, 1], xqkv[:, :, 2]   # (B,S,H,D)

        q = jnp.transpose(xq, (0, 2, 1, 3))     # (B,H,S,D)
        k = jnp.transpose(xk, (0, 2, 1, 3))
        v = jnp.transpose(xv, (0, 2, 1, 3))

        # RoPE tables for positions [start_pos, start_pos + S); the rotate-half
        # sign is folded into the sin table (saves iota/where/mul in-kernel).
        cos = self.cos_tab[self.start_pos:self.start_pos + S]      # (S, D/2)
        sin = self.sin_tab[self.start_pos:self.start_pos + S]
        cos_full = jnp.concatenate([cos, cos], axis=-1)            # (S, D)
        sin_signed = jnp.concatenate([-sin, sin], axis=-1)         # (S, D)

        mask = None
        if attention_mask is not None:
            mask = attention_mask.astype(jnp.float32)              # (B,1,S,S)

        o, k_rot = pallas_attention(q, k, v, cos_full, sin_signed, mask,
                                    causal=is_causal)

        out = jnp.transpose(o, (0, 2, 1, 3)).reshape(B, S, self.hidden_size)
        attn_output = pallas_linear(out.reshape(B * S, self.hidden_size),
                                    self.o_w, self.o_b,
                                    out_dtype=hidden_states.dtype
                                    ).reshape(B, S, self.hidden_size)

        # --- KV-cache writeback (functional emulation of torch in-place store)
        # TODO(synk): fuse into the attention kernel via input_output_aliases +
        # scalar-prefetched start_pos so the whole cache isn't copied each call.
        xk_rot = jnp.transpose(k_rot, (0, 2, 1, 3))                # (B,S,H,D)
        values_store = v.astype(jnp.float16)                       # (B,H,S,D)
        keys_store = jnp.transpose(
            xk_rot.reshape(B, S, H, D // 8, 8), (0, 2, 3, 1, 4)
        ).astype(jnp.float16)                                      # (B,H,D/8,S,8)
        self.cache_v = lax.dynamic_update_slice(
            self.cache_v, values_store, (0, 0, self.start_pos, 0))
        self.cache_k = lax.dynamic_update_slice(
            self.cache_k, keys_store, (0, 0, 0, self.start_pos, 0))

        past_key_value = (xk_rot, xv) if use_cache else None
        if use_cache:
            self.start_pos += S
        else:
            self.start_pos = 0
        return attn_output, None, past_key_value


# ---------------------------------------------------------------------------
# Pure-JAX reference (mirrors the PyTorch forward; bf16 matmul operands to
# match the kernel's MXU precision, f32 accumulation everywhere)
# ---------------------------------------------------------------------------
def reference_forward(x, qkv_w, qkv_b, o_w, o_b, cos_tab, sin_tab, mask,
                      hidden, num_heads):
    B, S, _ = x.shape
    H, D = num_heads, hidden // num_heads
    bf = lambda a: a.astype(jnp.bfloat16)

    xqkv = (jnp.dot(bf(x.reshape(B * S, hidden)), bf(qkv_w),
                    preferred_element_type=jnp.float32) + qkv_b)
    xqkv = xqkv.reshape(B, S, 3, H, D)
    xq, xk, xv = xqkv[:, :, 0], xqkv[:, :, 1], xqkv[:, :, 2]

    cos = jnp.concatenate([cos_tab[:S], cos_tab[:S]], -1)[None, :, None, :]
    sin = jnp.concatenate([sin_tab[:S], sin_tab[:S]], -1)[None, :, None, :]

    def rope(t):
        half = D // 2
        t1, t2 = t[..., :half], t[..., half:]
        rot = jnp.concatenate([-t2, t1], -1)
        return t * cos + rot * sin

    q = jnp.transpose(rope(xq), (0, 2, 1, 3))
    k = jnp.transpose(rope(xk), (0, 2, 1, 3))
    v = jnp.transpose(xv, (0, 2, 1, 3))

    s = jnp.einsum("bhqd,bhkd->bhqk", bf(q), bf(k),
                   preferred_element_type=jnp.float32) / math.sqrt(D)
    s = s + mask
    p = jax.nn.softmax(s, axis=-1)
    o = jnp.einsum("bhqk,bhkd->bhqd", bf(p), bf(v),
                   preferred_element_type=jnp.float32)
    o = jnp.transpose(o, (0, 2, 1, 3)).reshape(B * S, hidden)
    out = jnp.dot(bf(o), bf(o_w), preferred_element_type=jnp.float32) + o_b
    return out.reshape(B, S, hidden)


# ---------------------------------------------------------------------------
if __name__ == "__main__":
    hidden_size = 256
    num_heads = 2
    head_dim = hidden_size // num_heads          # 128 -> lane-dense last dim
    max_position_embeddings = 32
    B, S = 1, 16                                 # cache layout implies bsz == 1

    key = jax.random.PRNGKey(0)
    k1, k2, k3, k4, k5 = jax.random.split(key, 5)
    scale = 0.05
    qkv_w = jax.random.normal(k1, (hidden_size, 3 * hidden_size), jnp.float32) * scale
    qkv_b = jax.random.normal(k2, (3 * hidden_size,), jnp.float32) * scale
    o_w = jax.random.normal(k3, (hidden_size, hidden_size), jnp.float32) * scale
    o_b = jax.random.normal(k4, (hidden_size,), jnp.float32) * scale
    hidden_states = jax.random.normal(k5, (B, S, hidden_size), jnp.float32)

    # additive causal mask, shape (B, 1, S, S)
    causal = jnp.where(jnp.arange(S)[:, None] >= jnp.arange(S)[None, :],
                       0.0, -1e9).astype(jnp.float32)
    attention_mask = jnp.broadcast_to(causal, (B, 1, S, S))

    attn = QuantLlamaAttentionFusedPallas(
        hidden_size, num_heads, qkv_w, qkv_b, o_w, o_b, max_position_embeddings)

    ref = reference_forward(hidden_states, qkv_w, qkv_b, o_w, o_b,
                            attn.cos_tab, attn.sin_tab, attention_mask,
                            hidden_size, num_heads)

    # Path 1: explicit additive mask (exactly the PyTorch module's semantics).
    out_masked, _, _ = attn(hidden_states, attention_mask=attention_mask,
                            use_cache=False)
    out_masked = jax.block_until_ready(out_masked)

    # Path 2: in-kernel causal mask (no SxS mask tensor in HBM) + KV cache.
    out_causal, _, past_kv = attn(hidden_states, attention_mask=None,
                                  is_causal=True, use_cache=True)
    out_causal = jax.block_until_ready(out_causal)

    assert jnp.allclose(out_masked, ref, atol=2e-2, rtol=2e-2), \
        "explicit-mask path mismatch vs reference"
    assert jnp.allclose(out_causal, ref, atol=2e-2, rtol=2e-2), \
        "in-kernel causal path mismatch vs reference"
    assert past_kv is not None and past_kv[0].shape == (B, S, num_heads, head_dim)
    assert attn.cache_k.shape == (1, num_heads, head_dim // 8,
                                  max_position_embeddings, 8)
    print("KERNEL_OK")
</pallas_src>

<mosaic_0001>
module attributes {stable_mosaic.version = 11 : i64} {
  func.func @_linear_kernel(%arg0: i32, %arg1: i32, %arg2: i32, %arg3: memref<16x256xbf16, #tpu.memory_space<vmem>>, %arg4: memref<256x256xbf16, #tpu.memory_space<vmem>>, %arg5: memref<1x256xf32, #tpu.memory_space<vmem>>, %arg6: memref<16x256xf32, #tpu.memory_space<vmem>>, %arg7: memref<16x256xf32, #tpu.memory_space<vmem>>) attributes {dimension_semantics = [#tpu.dimension_semantics<parallel>, #tpu.dimension_semantics<parallel>, #tpu.dimension_semantics<arbitrary>], iteration_bounds = array<i64: 1, 3, 1>, scalar_prefetch = 0 : i64, scratch_operands = 1 : i64, tpu.core_type = #tpu.core_type<tc>, window_params = [{transform_indices = @transform_0, window_bounds = array<i64: 16, 256>}, {transform_indices = @transform_1, window_bounds = array<i64: 256, 256>}, {transform_indices = @transform_2, window_bounds = array<i64: 1, 256>}, {transform_indices = @transform_3, window_bounds = array<i64: 16, 256>}]} {
    %c0_i32 = arith.constant 0 : i32
    %0 = arith.cmpi eq, %arg2, %c0_i32 : i32
    %1 = arith.extui %0 : i1 to i32
    %c0_i32_0 = arith.constant 0 : i32
    %2 = arith.cmpi ne, %1, %c0_i32_0 : i32
    scf.if %2 {
      %cst_10 = arith.constant 0.000000e+00 : f32
      %12 = vector.broadcast %cst_10 : f32 to vector<16x256xf32>
      %c0_11 = arith.constant 0 : index
      %c0_12 = arith.constant 0 : index
      %13 = vector.load %arg7[%c0_11, %c0_12] : memref<16x256xf32, #tpu.memory_space<vmem>>, vector<16x256xf32>
      tpu.vector_store %arg7[%c0_11, %c0_12], %12 {strides = array<i32>} : memref<16x256xf32, #tpu.memory_space<vmem>>, vector<16x256xf32>,
    } else {
    }
    %c0 = arith.constant 0 : index
    %c0_1 = arith.constant 0 : index
    %3 = vector.load %arg7[%c0, %c0_1] : memref<16x256xf32, #tpu.memory_space<vmem>>, vector<16x256xf32>
    %c0_2 = arith.constant 0 : index
    %c0_3 = arith.constant 0 : index
    %4 = vector.load %arg3[%c0_2, %c0_3] : memref<16x256xbf16, #tpu.memory_space<vmem>>, vector<16x256xbf16>
    %c0_4 = arith.constant 0 : index
    %c0_5 = arith.constant 0 : index
    %5 = vector.load %arg4[%c0_4, %c0_5] : memref<256x256xbf16, #tpu.memory_space<vmem>>, vector<256x256xbf16>
    %cst = arith.constant dense<0.000000e+00> : vector<16x256xf32>
    %6 = tpu.matmul %4, %5, %cst {dimension_numbers = #tpu.dot_dimension_numbers<[1], [0], [0], [1], [0, 0, 1, 1], [], []>} : vector<16x256xbf16>, vector<256x256xbf16>, vector<16x256xf32> -> vector<16x256xf32>
    %7 = arith.addf %3, %6 : vector<16x256xf32>
    %c0_6 = arith.constant 0 : index
    %c0_7 = arith.constant 0 : index
    %8 = vector.load %arg7[%c0_6, %c0_7] : memref<16x256xf32, #tpu.memory_space<vmem>>, vector<16x256xf32>
    tpu.vector_store %arg7[%c0_6, %c0_7], %7 {strides = array<i32>} : memref<16x256xf32, #tpu.memory_space<vmem>>, vector<16x256xf32>,
    %c0_i32_8 = arith.constant 0 : i32
    %9 = arith.cmpi eq, %arg2, %c0_i32_8 : i32
    %10 = arith.extui %9 : i1 to i32
    %c0_i32_9 = arith.constant 0 : i32
    %11 = arith.cmpi ne, %10, %c0_i32_9 : i32
    scf.if %11 {
      %c0_10 = arith.constant 0 : index
      %c0_11 = arith.constant 0 : index
      %12 = vector.load %arg7[%c0_10, %c0_11] : memref<16x256xf32, #tpu.memory_space<vmem>>, vector<16x256xf32>
      %c0_12 = arith.constant 0 : index
      %c0_13 = arith.constant 0 : index
      %13 = vector.load %arg5[%c0_12, %c0_13] : memref<1x256xf32, #tpu.memory_space<vmem>>, vector<1x256xf32>
      %14 = vector.broadcast %13 : vector<1x256xf32> to vector<16x256xf32>
      %15 = arith.addf %12, %14 : vector<16x256xf32>
      %c0_14 = arith.constant 0 : index
      %c0_15 = arith.constant 0 : index
      %16 = vector.load %arg6[%c0_14, %c0_15] : memref<16x256xf32, #tpu.memory_space<vmem>>, vector<16x256xf32>
      tpu.vector_store %arg6[%c0_14, %c0_15], %15 {strides = array<i32>} : memref<16x256xf32, #tpu.memory_space<vmem>>, vector<16x256xf32>,
    } else {
    }
    return
  }
  func.func @transform_0(%arg0: i32, %arg1: i32, %arg2: i32) -> (i32, i32) {
    %c0_i32 = arith.constant 0 : i32
    return %arg0, %arg2 : i32, i32
  }
  func.func @transform_1(%arg0: i32, %arg1: i32, %arg2: i32) -> (i32, i32) {
    %c0_i32 = arith.constant 0 : i32
    return %arg2, %arg1 : i32, i32
  }
  func.func @transform_2(%arg0: i32, %arg1: i32, %arg2: i32) -> (i32, i32) {
    %c0_i32 = arith.constant 0 : i32
    %c0_i32_0 = arith.constant 0 : i32
    return %c0_i32, %arg1 : i32, i32
  }
  func.func @transform_3(%arg0: i32, %arg1: i32, %arg2: i32) -> (i32, i32) {
    %c0_i32 = arith.constant 0 : i32
    return %arg0, %arg1 : i32, i32
  }
}

</mosaic_0001>

<bundles_post_ra>
// kernel: tpu_custom_call.1
= control target key start
LH: loop header
LB: loop body
LE: loop exit
PB: predicated region body
PF: predicated region fallthrough
CT: control target
= control target key end

     0   :  { %8 = vsyncpa [#allocation4], 0  ;;  %s1309_s0 = inlined_call_operand.hbm [shape: bf16[16,256], index: 0, kind: input, shape index: {}]   ;;  %s1310_s1 = inlined_call_operand.hbm [shape: bf16[256,768], index: 1, kind: input, shape index: {}]   ;;  %s1311_s2 = inlined_call_operand.vmem [shape: f32[1,768], index: 2, kind: input, shape index: {}]   ;;  %s1312_s3 = inlined_call_operand.hbm [shape: f32[16,768], index: 3, kind: output, shape index: {}]  }
   0x1   :  { %9 = vsyncpa [#allocation7], 0 }
   0x2   :  { %11 = vsyncpa [#allocation7 + $0x1], 0 }
   0x3   :  { %12 = vsyncpa [#allocation5], 0 }
   0x4   :  { %14 = vsyncpa [#allocation5 + $0x1], 0  ;;  %s1054_s12 = smov 0   ;;  %s1056_s13 = smov 0  }
   0x5   :  { %s1058_s14 = smov 0   ;;  %s1060_s15 = smov 0  }
   0x6   :  { %s1062_s16 = smov 0   ;;  %s1064_s17 = smov 0  }
   0x7 LB: > { %s695_s18 = sadd.s32 4294967295, %s1023_s17   ;;  %s696_s19 = sadd.s32 4294967294, %s1023_s17   ;;  %s1023_s17 = sphi %s1064_s17, %s20_s17   ;;  %s1019_s16 = sphi %s1062_s16, %s1339_s16   ;;  %s1015_s15 = sphi %s1060_s15, %s1338_s15   ;;  %s1011_s14 = sphi %s1058_s14, %s1337_s14   ;;  %s1007_s13 = sphi %s1056_s13, %s1336_s13   ;;  %s1003_s12 = sphi %s1054_s12, %s1335_s12  }
   0x8   : > { %p83_p0 = scmp.ne.s32.totalorder %s1011_s14, %s1007_s13  ;;  %p84_p1 = scmp.eq.s32.totalorder %s1023_s17, 0 }
   0x9   : > { %p89_p2 = scmp.ne.s32.totalorder %s1007_s13, %s1003_s12  ;;  %p1091_p3 = scmp.eq.s32.totalorder %s695_s18, 0 }
   0xa   : > { %p1095_p4 = por %p84_p1, %p83_p0  ;;  %p141_p5 = scmp.eq.s32.totalorder %s695_s18, 2 }
   0xb   : > { %s1320_s20 = scalar_select %p1091_p3, 1, 0 }
   0xc   : > { %p1101_p6 = por %p1091_p3, %p89_p2  ;;  %p147_p7 = scmp.eq.s32.totalorder %s696_s19, 2 }
   0xd   : > { %p1105_p8 = por %p141_p5, %p83_p0  ;;  %p697_p9 = scmp.ge.s32.totalorder %s1023_s17, 1 }
   0xe   : > { %s1322_s22 = scalar_select %p1101_p6, 1, 0 }
   0xf   : > { %s1323_s23 = scalar_select %p1105_p8, 1, 0 }
  0x10   : > { %p1110_p10 = por %p147_p7, %p89_p2  ;;  %p154_p11 = scmp.lt.s32.totalorder %s1023_s17, 4 }
  0x11   : > { %s1025_s26 = smov [#allocation3]   ;;  %p770_p0 = scmp.lt.s32.totalorder %s1023_s17, 3 }
  0x12   : > { %s1324_s24 = scalar_select %p1110_p10, 1, 0 }
  0x13   : > { %p1115_p12 = pnand %p697_p9, %p154_p11  ;;  %s172_s27 = sshll.u32 %s1025_s26, 4  ;;  %s173_s27 = int_to_ptr.vmem [resolvable:$true] %s172_s27 }
  0x14   : > { %p1130_p2 = pnand %p770_p0, %p1095_p4  ;;  %s35_s30 = sadd.s32 1, %s1019_s16 }
  0x15   : > { %s1325_s25 = scalar_select %p1115_p12, 1, 0 }
  0x16   : > { %p757_p13 = pneg %p1115_p12  ;;  %s879_s6 = scalar_lea.hbm %s1309_s0, 256 }
  0x17   : > { %s1327_s29 = scalar_select %p1130_p2, 1, 0 }
  0x18   : > { %p1124_p1 = pnand %p757_p13, %p1091_p3  ;;  %p880_p5 = scmp.ne.s32.totalorder %s1309_s0, %s879_s6 }
  0x19   : > { %p886_p4 = scmp.lt.u32.totalorder %s879_s6, %s1309_s0 }
  0x1a   : > { %p881_p7 = pneg %p1124_p1 }
  0x1c   : > { %p882_p9 = pnand %p881_p7, %p880_p5 }
  0x1e   : > { %p883_p11 = pneg %p882_p9 }
  0x20   : > { %p888_p13 = pnand %p886_p4, %p883_p11 }
  0x22   : > { %891 = shalt.err (!%p888_p13)
}
  0x23   : > { %s892_s11 = scalar_lea.vmem %s173_s27, 256  ;;  %p900_p6 = scmp.lt.s32.totalorder %s173_s27, %s173_s27 }
  0x24   : > { %p893_p0 = scmp.ne.s32.totalorder %s173_s27, %s892_s11  ;;  %p901_p3 = scmp.lt.s32.totalorder %s892_s11, %s892_s11 }
  0x26   : > { %p895_p10 = pnand %p893_p0, %p881_p7  ;;  %p902_p12 = por %p901_p3, %p900_p6 }
  0x28   : > { %p896_p8 = pneg %p895_p10 }
  0x2a   : > { %p903_p2 = pnand %p902_p12, %p896_p8 }
  0x2c   : > { %906 = shalt.err (!%p903_p2)
}
  0x2d   : > { %s1319_s18 = smov 128   ;;  %s1027_s19 = smov 8  }
  0x2e   : > { %760 = dma.hbm_to_vmem [thread:$0]  (!%p1124_p1), %s1309_s0, 256, %s173_s27, [#allocation4], %s1319_s18, %s1319_s18, %s1027_s19  }
  0x2f   : > { %p37_p10 = scmp.ge.s32.totalorder %s35_s30, 3  ;;  %s76_s4 = sadd.s32 1, %s1011_s14 }
  0x30   : > { %s186_s5 = sand.u32 1, %s1011_s14   ;;  %s747_s8 = sshll.u32 %s1019_s16, 7 }
  0x31   : > { %s1341_s30 = smov (%p37_p10, %s35_s30), 0  ;;  %s700_s6 = sshll.u32 %s186_s5, 8 }
  0x32   : > { %s72_s7 = ssub.s32 %s1019_s16, %s1341_s30  ;;  %s1164_s10 = scalar_lea.hbm %s1310_s1, %s747_s8 }
  0x33   : > { %p74_p3 = scmp.eq.s32.totalorder %s72_s7, 0  ;;  %s190_s27 = scalar_lea.vmem [#allocation6], %s700_s6 }
  0x34   : > { %s200_s11 = sshll.u32 %s190_s27, 4  ;;  %s1171_s26 = scalar_lea.sflag [#allocation7], %s186_s5  ;;  %s1169_s11 = int_to_ptr.vmem [resolvable:$true] %s200_s11 }
  0x35   : > { %s1167_s21 = scalar_select %p74_p3, %s1011_s14, %s76_s4  }
  0x36   : > { %s907_s18 = scalar_lea.hbm %s1164_s10, 4096  ;;  %p1328_p8 = scmp.ne.s32.totalorder %s1327_s29, 0 }
  0x37   : > { %p908_p6 = scmp.ne.s32.totalorder %s1164_s10, %s907_s18  ;;  %s912_s28 = scalar_lea.hbm %s1310_s1, 12288 }
  0x38   : > { %p909_p12 = pneg %p1328_p8  ;;  %p913_p5 = scmp.lt.u32.totalorder %s1164_s10, %s1310_s1 }
  0x39   : > { %p914_p7 = scmp.lt.u32.totalorder %s912_s28, %s907_s18  ;;  %p916_p11 = scmp.lt.u32.totalorder %s907_s18, %s1164_s10 }
  0x3a   : > { %p910_p1 = pnand %p909_p12, %p908_p6 }
  0x3b   : > { %p915_p9 = por %p914_p7, %p913_p5 }
  0x3c   : > { %p911_p2 = pneg %p910_p1 }
  0x3d   : > { %p917_p4 = por %p916_p11, %p915_p9 }
  0x3f   : > { %p918_p13 = pnand %p917_p4, %p911_p2 }
  0x41   : > { %921 = shalt.err (!%p918_p13)
}
  0x42   : > { %s922_s4 = scalar_lea.vmem %s1169_s11, 4096  ;;  %s1028_s5 = smov [#allocation6]  }
  0x43   : > { %p923_p0 = scmp.ne.s32.totalorder %s1169_s11, %s922_s4  ;;  %s927_s27 = sshll.u32 %s1028_s5, 4  ;;  %s928_s27 = int_to_ptr.vmem [resolvable:$false] %s927_s27 }
  0x44   : > { %s929_s7 = scalar_lea.vmem %s928_s27, 8192  ;;  %p930_p6 = scmp.lt.s32.totalorder %s1169_s11, %s928_s27 }
  0x45   : > { %p925_p10 = pnand %p923_p0, %p909_p12  ;;  %p931_p1 = scmp.lt.s32.totalorder %s929_s7, %s922_s4 }
  0x47   : > { %p926_p3 = pneg %p925_p10  ;;  %p932_p5 = por %p931_p1, %p930_p6 }
  0x49   : > { %p933_p7 = pnand %p932_p5, %p926_p3 }
  0x4b   : > { %936 = shalt.err (!%p933_p7)
}
  0x4c   : > { %s1029_s18 = smov 384   ;;  %s1329_s8 = smov 128  }
  0x4d   : > { %764 = dma.hbm_to_vmem [thread:$0]  (!%p1328_p8), %s1164_s10, 4096, %s1169_s11, %s1171_s26, %s1029_s18, %s1329_s8, %s1027_s19  }
  0x4e   : > { %p1330_p12 = scmp.ne.s32.totalorder %s1325_s25, 0 }
  0x4f   : > { %p1331_p2 = scmp.ne.s32.totalorder (!%p1330_p12), %s1320_s20, 0 }
  0x50   : > { %220 = sbr.rel (%p1330_p12) target bundleno = 390 (0x186), region = 32 }
  0x57   : > { %990 = dma.done.wait (%p1331_p2), [#allocation4], 256  }
  0x58   : > { %992 = vsyncadd (%p1331_p2), [#allocation4], 4294967040  ;;  %s1208_s28 = sand.u32 1, %s1007_s13   ;;  %p1332_p8 = scmp.ne.s32.totalorder %s1322_s22, 0 }
  0x59   : > { %s705_s29 = sshll.u32 %s1208_s28, 8  ;;  %s227_s6 = scalar_lea.sflag [#allocation7], %s1208_s28 }
  0x5a   : > { %s1212_s9 = scalar_lea.vmem [#allocation6], %s705_s29 }
  0x5b   : > { %994 = dma.done.wait (%p1332_p8), %s227_s6, 4096  }
  0x5c   : > { %996 = vsyncadd (%p1332_p8), %s227_s6, 4294963200  ;;  %v828_v0 = vld [vmem:[%s1212_s9 + $0x4] ss:$8 sps:$4 sm:$0xff]   ;;  %v830_v1 = vld [vmem:[%s1212_s9] ss:$8 sps:$4 sm:$0xff]   ;;  %s707_s20 = sshll.u32 %s1015_s15, 1  ;;  %v544_v34 = vlaneseq }
  0x5d   : > { %484 = vmatprep.subr.bf16.mxu0 %v828_v0  ;;  %v831_v2 = vld [vmem:[%s1212_s9 + $0x14] ss:$8 sps:$4 sm:$0xff]   ;;  %v833_v3 = vld [vmem:[%s1212_s9 + $0x10] ss:$8 sps:$4 sm:$0xff]   ;;  %v834_v4 = vld [vmem:[%s1212_s9 + $0x24] ss:$8 sps:$4 sm:$0xff]  }
  0x5e   : > { %485 = vmatpush1.bf16.msra.mxu0 %v830_v1  ;;  %v836_v5 = vld [vmem:[%s1212_s9 + $0x20] ss:$8 sps:$4 sm:$0xff]   ;;  %v837_v6 = vld [vmem:[%s1212_s9 + $0x34] ss:$8 sps:$4 sm:$0xff]   ;;  %v839_v7 = vld [vmem:[%s1212_s9 + $0x30] ss:$8 sps:$4 sm:$0xff]  }
  0x5f   : > { %486 = vmatprep.subr.bf16.mxu0 %v831_v2  ;;  %v840_v8 = vld [vmem:[%s1212_s9 + $0x44] ss:$8 sps:$4 sm:$0xff]   ;;  %v842_v9 = vld [vmem:[%s1212_s9 + $0x40] ss:$8 sps:$4 sm:$0xff]   ;;  %v843_v10 = vld [vmem:[%s1212_s9 + $0x54] ss:$8 sps:$4 sm:$0xff]  }
  0x60   : > { %v845_v11 = vld [vmem:[%s1212_s9 + $0x50] ss:$8 sps:$4 sm:$0xff]   ;;  %v846_v12 = vld [vmem:[%s1212_s9 + $0x64] ss:$8 sps:$4 sm:$0xff]   ;;  %v878_v13 = vld [vmem:[#allocation3 + $0x4] ss:$8 sps:$4 sm:$0xff]  }
  0x61   : > { %v848_v14 = vld [vmem:[%s1212_s9 + $0x60] ss:$8 sps:$4 sm:$0xff]   ;;  %v849_v15 = vld [vmem:[%s1212_s9 + $0x74] ss:$8 sps:$4 sm:$0xff]   ;;  %516 = vmatprep.mubr.bf16.mxu0 %v878_v13  ;;  %v851_v16 = vld [vmem:[%s1212_s9 + $0x70] ss:$8 sps:$4 sm:$0xff]  }
  0x62   : > { %487 = vmatpush1.bf16.msra.mxu0 %v833_v3  ;;  %v852_v17 = vld [vmem:[%s1212_s9 + $0x84] ss:$8 sps:$4 sm:$0xff]   ;;  %v854_v18 = vld [vmem:[%s1212_s9 + $0x80] ss:$8 sps:$4 sm:$0xff]   ;;  %v855_v19 = vld [vmem:[%s1212_s9 + $0x94] ss:$8 sps:$4 sm:$0xff]  }
  0x63   : > { %488 = vmatprep.subr.bf16.mxu0 %v834_v4  ;;  %v857_v20 = vld [vmem:[%s1212_s9 + $0x90] ss:$8 sps:$4 sm:$0xff]   ;;  %v858_v21 = vld [vmem:[%s1212_s9 + $0xa4] ss:$8 sps:$4 sm:$0xff]   ;;  %v860_v22 = vld [vmem:[%s1212_s9 + $0xa0] ss:$8 sps:$4 sm:$0xff]  }
  0x64   : > { %v861_v23 = vld [vmem:[%s1212_s9 + $0xb4] ss:$8 sps:$4 sm:$0xff]   ;;  %v863_v24 = vld [vmem:[%s1212_s9 + $0xb0] ss:$8 sps:$4 sm:$0xff]   ;;  %v864_v25 = vld [vmem:[%s1212_s9 + $0xc4] ss:$8 sps:$4 sm:$0xff]  }
  0x65   : > { %v866_v26 = vld [vmem:[%s1212_s9 + $0xc0] ss:$8 sps:$4 sm:$0xff]   ;;  %v867_v27 = vld [vmem:[%s1212_s9 + $0xd4] ss:$8 sps:$4 sm:$0xff]   ;;  %v869_v28 = vld [vmem:[%s1212_s9 + $0xd0] ss:$8 sps:$4 sm:$0xff]  }
  0x66   : > { %489 = vmatpush1.bf16.msra.mxu0 %v836_v5  ;;  %v870_v29 = vld [vmem:[%s1212_s9 + $0xe4] ss:$8 sps:$4 sm:$0xff]   ;;  %v872_v30 = vld [vmem:[%s1212_s9 + $0xe0] ss:$8 sps:$4 sm:$0xff]   ;;  %v873_v31 = vld [vmem:[%s1212_s9 + $0xf4] ss:$8 sps:$4 sm:$0xff]  }
  0x67   : > { %490 = vmatprep.subr.bf16.mxu0 %v837_v6  ;;  %v875_v32 = vld [vmem:[%s1212_s9 + $0xf0] ss:$8 sps:$4 sm:$0xff]   ;;  %p262_p9 = scmp.lt.s32.totalorder %s707_s20, 5  ;;  %v545_v35 = vshrl.u32 %v544_v34, 7  ;;  %s706_s10 = sshll.u32 %s1208_s28, 5 }
  0x68   : > { %v876_v33 = vld [vmem:[#allocation3] ss:$8 sps:$4 sm:$0xff]   ;;  %s256_s11 = scalar_lea.vmem [#allocation8], %s706_s10  ;;  %s748_s4 = sshll.u32 %s1015_s15, 8 }
  0x69   : > { %s1343_s20 = smov (!%p262_p9, %s707_s20), 5  ;;  %v546_v36 = vsub.s32 0, %v545_v35  ;;  %v550_v38 = vsub.s32 1, %v545_v35  ;;  %s579_s26 = sshll.u32 %s256_s11, 4  ;;  %s1256_s26 = int_to_ptr.vmem [resolvable:$true] %s579_s26 }
  0x6a   : > { %491 = vmatpush1.bf16.msra.mxu0 %v839_v7  ;;  %s264_s19 = scalar_lea.vmem %s1311_s2, %s1343_s20  ;;  %s1261_s7 = scalar_lea.hbm %s1312_s3, %s748_s4 }
  0x6b   : > { %492 = vmatprep.subr.bf16.mxu0 %v840_v8  ;;  %v542_v37 = vld [vmem:[%s264_s19] sm:$0x3]  ;;  %s563_s15 = scalar_lea.sflag [#allocation5], %s1208_s28  ;;  %s937_s18 = scalar_lea.vmem %s1256_s26, 512 }
  0x6c   : > { %v547_v39 = vrot.slane %v542_v37, %v546_v36  ;;  %v551_v40 = vrot.slane %v542_v37, %v550_v38  ;;  %p938_p11 = scmp.ne.s32.totalorder %s1256_s26, %s937_s18  ;;  %p1333_p4 = scmp.ne.s32.totalorder %s1323_s23, 0 }
  0x6d   : > { %s1030_s8 = smov [#allocation8]  }
  0x6e   : > { %493 = vmatpush1.bf16.msra.mxu0 %v842_v9  ;;  %p939_p13 = pnand %p938_p11, %p1333_p4  ;;  %s941_s29 = sshll.u32 %s1030_s8, 4  ;;  %s942_s29 = int_to_ptr.vmem [resolvable:$false] %s941_s29 }
  0x6f   : > { %494 = vmatprep.subr.bf16.mxu0 %v843_v10  ;;  %s943_s6 = scalar_lea.vmem %s942_s29, 1024  ;;  %p944_p10 = scmp.lt.s32.totalorder %s1256_s26, %s942_s29 }
  0x70   : > { %p940_p0 = pneg %p939_p13  ;;  %p945_p3 = scmp.lt.s32.totalorder %s943_s6, %s937_s18 }
  0x72   : > { %495 = vmatpush1.bf16.msra.mxu0 %v845_v11  ;;  %p946_p6 = por %p945_p3, %p944_p10 }
  0x73   : > { %496 = vmatprep.subr.bf16.mxu0 %v846_v12 }
  0x74   : > { %p947_p1 = pnand %p946_p6, %p940_p0 }
  0x76   : > { %497 = vmatpush1.bf16.msra.mxu0 %v848_v14 }
  0x77   : > { %498 = vmatprep.subr.bf16.mxu0 %v849_v15 }
  0x7a   : > { %499 = vmatpush1.bf16.msra.mxu0 %v851_v16 }
  0x7b   : > { %500 = vmatprep.subr.bf16.mxu0 %v852_v17 }
  0x7e   : > { %501 = vmatpush1.bf16.msra.mxu0 %v854_v18 }
  0x7f   : > { %502 = vmatprep.subr.bf16.mxu0 %v855_v19 }
  0x82   : > { %503 = vmatpush1.bf16.msra.mxu0 %v857_v20 }
  0x83   : > { %504 = vmatprep.subr.bf16.mxu0 %v858_v21 }
  0x86   : > { %505 = vmatpush1.bf16.msra.mxu0 %v860_v22 }
  0x87   : > { %506 = vmatprep.subr.bf16.mxu0 %v861_v23 }
  0x8a   : > { %507 = vmatpush1.bf16.msra.mxu0 %v863_v24 }
  0x8b   : > { %508 = vmatprep.subr.bf16.mxu0 %v864_v25 }
  0x8e   : > { %509 = vmatpush1.bf16.msra.mxu0 %v866_v26 }
  0x8f   : > { %510 = vmatprep.subr.bf16.mxu0 %v867_v27 }
  0x92   : > { %511 = vmatpush1.bf16.msra.mxu0 %v869_v28 }
  0x93   : > { %512 = vmatprep.subr.bf16.mxu0 %v870_v29 }
  0x96   : > { %513 = vmatpush1.bf16.msra.mxu0 %v872_v30 }
  0x97   : > { %514 = vmatprep.subr.bf16.mxu0 %v873_v31 }
  0x9a   : > { %515 = vmatpush1.bf16.msra.mxu0 %v875_v32 }
  0x9d   : > { %517 = vmatmul.mubr.bf16.vlgmr.msra.gmra.mrb[0].mxu0 %v876_v33 }
 0x170   : > { %v518_v41 = vpop.f32.mrb[0].mxu0 }
 0x171   : > { %v554_v42 = vadd.f32 %v547_v39, %v518_v41  ;;  %v520_v43 = vpop.f32.mrb[1].mxu0 }
 0x172   : > { %v555_v44 = vadd.f32 %v551_v40, %v520_v43  ;;  %v522_v45 = vpop.f32.mrb[2].mxu0 }
 0x173   : > { %558 = vst [vmem:[%s256_s11] sm:$0xff] %v554_v42  ;;  %v556_v46 = vadd.f32 %v547_v39, %v522_v45  ;;  %v524_v47 = vpop.f32.mrb[3].mxu0 }
 0x174   : > { %559 = vst [vmem:[%s256_s11 + $0x8] sm:$0xff] %v555_v44  ;;  %v557_v48 = vadd.f32 %v551_v40, %v524_v47 }
 0x175   : > { %560 = vst [vmem:[%s256_s11 + $0x10] sm:$0xff] %v556_v46 }
 0x176   : > { %561 = vst [vmem:[%s256_s11 + $0x18] sm:$0xff] %v557_v48 }
 0x177   : > { %950 = shalt.err (!%p947_p1)
}
 0x178   : > { %s951_s9 = scalar_lea.hbm %s1261_s7, 512  ;;  %s955_s25 = scalar_lea.hbm %s1312_s3, 1536 }
 0x179   : > { %p952_p5 = scmp.ne.s32.totalorder %s1261_s7, %s951_s9  ;;  %p956_p2 = scmp.lt.u32.totalorder %s1261_s7, %s1312_s3 }
 0x17a   : > { %p957_p8 = scmp.lt.u32.totalorder %s955_s25, %s951_s9  ;;  %p959_p11 = scmp.lt.u32.totalorder %s951_s9, %s1261_s7 }
 0x17b   : > { %p953_p7 = pnand %p952_p5, %p1333_p4 }
 0x17c   : > { %p958_p9 = por %p957_p8, %p956_p2 }
 0x17d   : > { %p954_p12 = pneg %p953_p7 }
 0x17e   : > { %p960_p13 = por %p959_p11, %p958_p9 }
 0x180   : > { %p961_p0 = pnand %p960_p13, %p954_p12 }
 0x182   : > { %964 = shalt.err (!%p961_p0)
}
 0x183   : > { %s1031_s11 = smov 256   ;;  %s1032_s4 = smov 768  }
 0x184   : > { %s1033_s5 = smov 16  }
 0x185   : > { %755 = dma.vmem_to_hbm [thread:$0]  (%p1333_p4), %s1256_s26, 512, %s1261_s7, %s563_s15, %s1031_s11, %s1032_s4, %s1033_s5  }
 0x186 PF: > { %p772_p10 = scmp.ge.s32.totalorder %s1023_s17, 2  ;;  %s594_s27 = sand.u32 1, %s1003_s12  }
 0x187   : > { %p1334_p3 = scmp.ne.s32.totalorder %s1324_s24, 0  ;;  %s595_s18 = scalar_lea.sflag [#allocation5], %s594_s27 }
 0x189   : > { %p766_p6 = pnand %p772_p10, %p1334_p3 }
 0x18b   : > { %998 = dma.done.wait (!%p766_p6), %s595_s18, 512  }
 0x18c   : > { %1000 = vsyncadd (!%p766_p6), %s595_s18, 4294966784  ;;  %s20_s17 = sadd.s32 1, %s1023_s17   ;;  %s1335_s12 = smov %s1007_s13 }
 0x18d   : > { %p17_p1 = scmp.ge.s32.totalorder %s20_s17, 5   ;;  %s1336_s13 = smov %s1011_s14 }
 0x18e   : > { %s1337_s14 = smov %s1167_s21  ;;  %s1338_s15 = smov %s1019_s16 }
 0x18f   : > { %s1339_s16 = smov %s1341_s30  ;;  %19 = sbr.rel (!%p17_p1) target bundleno = 7 (0x7), region = 94 }
 0x196   :  { %600 = vsyncpa [#allocation4], 1 }
 0x197   :  { %602 = vsyncpa [#allocation4 + $0x1], 1 }
 0x198   :  { %603 = vsyncpa [#allocation7], 1 }
 0x199   :  { %605 = vsyncpa [#allocation7 + $0x1], 1 }
 0x19a   :  { %606 = vsyncpa [#allocation5], 1 }
 0x19b   :  { %608 = vsyncpa [#allocation5 + $0x1], 1 }

</bundles_post_ra>
